<compile_context>
chip_gen: v5e
topology: v5e:2x2
jax: 0.10.0
libtpu: 0.0.40
codegen_flags: <defaults>
</compile_context>

<pallas_src>
import jax
import jax.numpy as jnp
from jax.experimental import pallas as pl
from jax.experimental.pallas import tpu as pltpu

EPS = 1e-5


def _round_up(v, m):
    return ((v + m - 1) // m) * m


def _make_layernorm_kernel(c_true, has_bias):
    """Kernel specialized (at trace time) on C and bias presence.

    NOTE: rows are fully independent (no cross-row reductions).  This
    invariant is required because the last grid block may be partial and
    its over-read rows contain unspecified data.
    """
    inv_c = 1.0 / float(c_true)  # Python float -> folded into the jaxpr, not captured

    def kernel(x_ref, w_ref, *rest):
        if has_bias:
            b_ref, o_ref = rest
        else:
            (o_ref,) = rest

        x = x_ref[...].astype(jnp.float32)

        # Two-pass mean / centered variance (matches F.layer_norm numerics).
        mean = jnp.sum(x, axis=-1, keepdims=True) * inv_c
        xc = x - mean
        var = jnp.sum(xc * xc, axis=-1, keepdims=True) * inv_c
        inv = jax.lax.rsqrt(var + EPS)  # EUP rsqrt rides free of the VALU

        y = xc * inv * w_ref[...]
        if has_bias:
            y = y + b_ref[...]
        o_ref[...] = y.astype(o_ref.dtype)

    return kernel


def layer_norm(x, weight, bias=None):
    """Matches torch.nn.functional.layer_norm(x, (C,), weight, bias, eps=1e-5)."""
    orig_shape = x.shape
    C = orig_shape[-1]
    x2 = x.reshape(-1, C)
    R = x2.shape[0]

    in_bytes = x2.dtype.itemsize
    out_dtype = x.dtype
    out_bytes = jnp.dtype(out_dtype).itemsize

    # --- row (sublane) tile ----------------------------------------------------
    # HBM-bandwidth-bound op: target ~8 MiB of input per block.  Working-set
    # budget counts double-buffered in+out blocks PLUS the f32 compute
    # intermediates (~3 copies: x, xc, y), kept under ~40 MiB so the 56 MiB
    # vmem_limit below is safe on every generation including v7x (64 MiB
    # physical per TC).
    sub = {4: 8, 2: 16, 1: 32}.get(in_bytes, 8)        # sublane packing per dtype
    bytes_per_row_io = C * (in_bytes + out_bytes)
    bytes_per_row_ws = 2 * bytes_per_row_io + 3 * C * 4

    target_rows = max(sub, (8 << 20) // max(1, C * in_bytes))
    vmem_cap_rows = max(sub, (40 << 20) // max(1, bytes_per_row_ws))
    tr = min(target_rows, vmem_cap_rows, 4096)

    # Keep the grid >= ~8 steps (when R allows) so both v7x TensorCores get
    # work and the DMA pipeline always has a block to prefetch.
    min_steps = 8
    tr = min(tr, max(sub, _round_up(pl.cdiv(R, min_steps), sub)))
    tr = max(sub, (tr // sub) * sub)                   # sublane-aligned

    grid = (pl.cdiv(R, tr),)                           # partial last block is fine

    # --- weight / bias (resident (1, C) blocks, full-extent last dim) ----------
    w2 = weight.astype(jnp.float32).reshape(1, C)
    has_bias = bias is not None
    args = [x2, w2]
    in_specs = [
        pl.BlockSpec((tr, C), lambda i: (i, 0)),
        pl.BlockSpec((1, C), lambda i: (0, 0)),
    ]
    if has_bias:
        b2 = bias.astype(jnp.float32).reshape(1, C)
        args.append(b2)
        in_specs.append(pl.BlockSpec((1, C), lambda i: (0, 0)))

    kernel = _make_layernorm_kernel(C, has_bias)

    # Double-buffered in+out tiles + f32 intermediates + weight/bias + headroom.
    block_ws = tr * bytes_per_row_ws + 2 * C * 4
    vmem_limit = int(min(56 << 20, max(32 << 20, block_ws + (8 << 20))))

    cost = pl.CostEstimate(
        flops=8 * R * C,
        transcendentals=R,
        bytes_accessed=R * C * (in_bytes + out_bytes) + 2 * C * 4,
    )

    # TODO(synk): for tiny C (< 128, e.g. the C=32 toy config) pack k logical
    # rows per 128-lane group with segmented reductions for lane-dense stores.

    out = pl.pallas_call(
        kernel,
        out_shape=jax.ShapeDtypeStruct((R, C), out_dtype),
        grid_spec=pltpu.PrefetchScalarGridSpec(
            num_scalar_prefetch=0,
            grid=grid,
            in_specs=in_specs,
            out_specs=pl.BlockSpec((tr, C), lambda i: (i, 0)),
        ),
        compiler_params=pltpu.CompilerParams(
            dimension_semantics=("parallel",),   # shards row blocks across TCs on v7x
            vmem_limit_bytes=vmem_limit,
        ),
        cost_estimate=cost,
    )(*args)

    return out.reshape(orig_shape)


def _reference(x, weight, bias):
    mean = jnp.mean(x, axis=-1, keepdims=True)
    var = jnp.mean((x - mean) ** 2, axis=-1, keepdims=True)
    y = (x - mean) / jnp.sqrt(var + EPS) * weight
    if bias is not None:
        y = y + bias
    return y


if __name__ == "__main__":
    key = jax.random.PRNGKey(0)

    # Shapes consistent with the GPT module: (batch, seq, hidden) = (2, 8, 32)
    B, T, C = 2, 8, 32
    x = jax.random.normal(key, (B, T, C), dtype=jnp.float32)
    weight = jnp.ones((C,), dtype=jnp.float32)   # module __init__: ones
    bias = jnp.zeros((C,), dtype=jnp.float32)    # module __init__ (bias=True): zeros

    y = layer_norm(x, weight, bias)              # bias=True path
    y_nb = layer_norm(x, weight, None)           # bias=False path (bias-free kernel)
    jax.block_until_ready((y, y_nb))

    assert jnp.allclose(y, _reference(x, weight, bias), atol=1e-5, rtol=1e-5)
    assert jnp.allclose(y_nb, _reference(x, weight, None), atol=1e-5, rtol=1e-5)

    # Exercise the full-extent non-128-multiple feature dim and a row count
    # that does not divide the tile (partial last block).
    k2 = jax.random.PRNGKey(0)
    C2 = 160
    x2 = jax.random.normal(k2, (3, 7, C2), dtype=jnp.float32)
    w2 = jnp.ones((C2,), dtype=jnp.float32)
    b2 = jnp.zeros((C2,), dtype=jnp.float32)
    y2 = layer_norm(x2, w2, b2)
    jax.block_until_ready(y2)
    assert jnp.allclose(y2, _reference(x2, w2, b2), atol=1e-5, rtol=1e-5)

    print("KERNEL_OK")
</pallas_src>

<mosaic_0001>
module attributes {stable_mosaic.version = 11 : i64} {
  func.func @kernel(%arg0: i32, %arg1: memref<8x32xf32, #tpu.memory_space<vmem>>, %arg2: memref<1x32xf32, #tpu.memory_space<vmem>>, %arg3: memref<1x32xf32, #tpu.memory_space<vmem>>, %arg4: memref<8x32xf32, #tpu.memory_space<vmem>>) attributes {dimension_semantics = [#tpu.dimension_semantics<parallel>], iteration_bounds = array<i64: 2>, scalar_prefetch = 0 : i64, scratch_operands = 0 : i64, tpu.core_type = #tpu.core_type<tc>, window_params = [{transform_indices = @transform_0, window_bounds = array<i64: 8, 32>}, {pipeline_mode = #tpu.pipeline_mode<synchronous>, transform_indices = @transform_1, window_bounds = array<i64: 1, 32>}, {pipeline_mode = #tpu.pipeline_mode<synchronous>, transform_indices = @transform_2, window_bounds = array<i64: 1, 32>}, {transform_indices = @transform_3, window_bounds = array<i64: 8, 32>}]} {
    %c0 = arith.constant 0 : index
    %c0_0 = arith.constant 0 : index
    %0 = vector.load %arg1[%c0, %c0_0] : memref<8x32xf32, #tpu.memory_space<vmem>>, vector<8x32xf32>
    %cst = arith.constant dense<0.000000e+00> : vector<8xf32>
    %1 = vector.multi_reduction <add>, %0, %cst [1] : vector<8x32xf32> to vector<8xf32>
    %2 = vector.shape_cast %1 : vector<8xf32> to vector<8x1xf32>
    %cst_1 = arith.constant 3.125000e-02 : f32
    %3 = vector.broadcast %cst_1 : f32 to vector<8x1xf32>
    %4 = arith.mulf %2, %3 : vector<8x1xf32>
    %5 = vector.broadcast %4 : vector<8x1xf32> to vector<8x32xf32>
    %6 = arith.subf %0, %5 : vector<8x32xf32>
    %7 = arith.mulf %6, %6 : vector<8x32xf32>
    %cst_2 = arith.constant dense<0.000000e+00> : vector<8xf32>
    %8 = vector.multi_reduction <add>, %7, %cst_2 [1] : vector<8x32xf32> to vector<8xf32>
    %9 = vector.shape_cast %8 : vector<8xf32> to vector<8x1xf32>
    %cst_3 = arith.constant 3.125000e-02 : f32
    %10 = vector.broadcast %cst_3 : f32 to vector<8x1xf32>
    %11 = arith.mulf %9, %10 : vector<8x1xf32>
    %cst_4 = arith.constant 9.99999974E-6 : f32
    %12 = vector.broadcast %cst_4 : f32 to vector<8x1xf32>
    %13 = arith.addf %11, %12 : vector<8x1xf32>
    %14 = math.rsqrt %13 : vector<8x1xf32>
    %15 = vector.broadcast %14 : vector<8x1xf32> to vector<8x32xf32>
    %16 = arith.mulf %6, %15 : vector<8x32xf32>
    %c0_5 = arith.constant 0 : index
    %c0_6 = arith.constant 0 : index
    %17 = vector.load %arg2[%c0_5, %c0_6] : memref<1x32xf32, #tpu.memory_space<vmem>>, vector<1x32xf32>
    %18 = vector.broadcast %17 : vector<1x32xf32> to vector<8x32xf32>
    %19 = arith.mulf %16, %18 : vector<8x32xf32>
    %c0_7 = arith.constant 0 : index
    %c0_8 = arith.constant 0 : index
    %20 = vector.load %arg3[%c0_7, %c0_8] : memref<1x32xf32, #tpu.memory_space<vmem>>, vector<1x32xf32>
    %21 = vector.broadcast %20 : vector<1x32xf32> to vector<8x32xf32>
    %22 = arith.addf %19, %21 : vector<8x32xf32>
    %c0_9 = arith.constant 0 : index
    %c0_10 = arith.constant 0 : index
    %23 = vector.load %arg4[%c0_9, %c0_10] : memref<8x32xf32, #tpu.memory_space<vmem>>, vector<8x32xf32>
    tpu.vector_store %arg4[%c0_9, %c0_10], %22 {strides = array<i32>} : memref<8x32xf32, #tpu.memory_space<vmem>>, vector<8x32xf32>,
    return
  }
  func.func @transform_0(%arg0: i32) -> (i32, i32) {
    %c0_i32 = arith.constant 0 : i32
    %c0_i32_0 = arith.constant 0 : i32
    return %arg0, %c0_i32 : i32, i32
  }
  func.func @transform_1(%arg0: i32) -> (i32, i32) {
    %c0_i32 = arith.constant 0 : i32
    %c0_i32_0 = arith.constant 0 : i32
    %c0_i32_1 = arith.constant 0 : i32
    return %c0_i32, %c0_i32_0 : i32, i32
  }
  func.func @transform_2(%arg0: i32) -> (i32, i32) {
    %c0_i32 = arith.constant 0 : i32
    %c0_i32_0 = arith.constant 0 : i32
    %c0_i32_1 = arith.constant 0 : i32
    return %c0_i32, %c0_i32_0 : i32, i32
  }
  func.func @transform_3(%arg0: i32) -> (i32, i32) {
    %c0_i32 = arith.constant 0 : i32
    %c0_i32_0 = arith.constant 0 : i32
    return %arg0, %c0_i32 : i32, i32
  }
}

</mosaic_0001>

<bundles_post_ra>
// kernel: tpu_custom_call.1
= control target key start
LH: loop header
LB: loop body
LE: loop exit
PB: predicated region body
PF: predicated region fallthrough
CT: control target
= control target key end

     0   :  { %8 = vsyncpa [#allocation3], 0  ;;  %s710_s0 = inlined_call_operand.hbm [shape: f32[16,32], index: 0, kind: input, shape index: {}]   ;;  %s711_s1 = inlined_call_operand.hbm [shape: f32[1,32], index: 1, kind: input, shape index: {}]   ;;  %s712_s2 = inlined_call_operand.vmem [shape: f32[1,32], index: 2, kind: input, shape index: {}]   ;;  %s713_s3 = inlined_call_operand.hbm [shape: f32[16,32], index: 3, kind: output, shape index: {}]  }
   0x1   :  { %10 = vsyncpa [#allocation3 + $0x1], 0 }
   0x2   :  { %11 = vsyncpa [#allocation6], 0 }
   0x3   :  { %12 = vsyncpa [#allocation4], 0 }
   0x4   :  { %14 = vsyncpa [#allocation4 + $0x1], 0  ;;  %s562_s12 = smov 0   ;;  %s564_s13 = smov 0  }
   0x5   :  { %s566_s14 = smov 0   ;;  %s568_s15 = smov 0  }
   0x6 LB: > { %s583_s16 = sadd.s32 4294967295, %s539_s15   ;;  %s334_s17 = sadd.s32 4294967294, %s539_s15   ;;  %s539_s15 = sphi %s568_s15, %s723_s15   ;;  %s535_s14 = sphi %s566_s14, %s722_s14   ;;  %s531_s13 = sphi %s564_s13, %s721_s13   ;;  %s527_s12 = sphi %s562_s12, %s720_s12  }
   0x7   : > { %p40_p0 = scmp.ne.s32.totalorder %s531_s13, %s527_s12  ;;  %p41_p1 = scmp.eq.s32.totalorder %s583_s16, 0 }
   0x8   : > { %p106_p2 = scmp.eq.s32.totalorder %s583_s16, 1  ;;  %p112_p3 = scmp.eq.s32.totalorder %s334_s17, 1 }
   0x9   : > { %p592_p4 = por %p41_p1, %p40_p0  ;;  %p335_p5 = scmp.ge.s32.totalorder %s539_s15, 1 }
   0xa   : > { %p597_p6 = por %p112_p3, %p40_p0  ;;  %p119_p7 = scmp.lt.s32.totalorder %s539_s15, 3 }
   0xb   : > { %s131_s22 = sshll.u32 %s711_s1, 4  ;;  %s541_s24 = smov [#allocation5]   ;;  %s132_s22 = int_to_ptr.hbm [resolvable:$true] %s131_s22 }
   0xc   : > { %p605_p8 = pnand %p335_p5, %p119_p7  ;;  %s133_s25 = sshll.u32 %s541_s24, 4  ;;  %s134_s25 = int_to_ptr.vmem [resolvable:$true] %s133_s25 }
   0xd   : > { %s615_s26 = sadd.s32 1, %s539_s15   ;;  %s27_s27 = sadd.s32 1, %s535_s14 }
   0xe   : > { %p356_p10 = pneg %p605_p8  ;;  %s24_s28 = ssub.s32 %s539_s15, %s615_s26 }
   0xf   : > { %p25_p12 = scmp.eq.s32.totalorder %s24_s28, 0  ;;  %p34_p13 = scmp.ne.s32.totalorder %s535_s14, %s531_s13 }
  0x10   : > { %p357_p11 = pnand %p356_p10, %p41_p1  ;;  %p35_p0 = scmp.eq.s32.totalorder %s539_s15, 0 }
  0x11   : > { %s624_s29 = scalar_select %p25_p12, %s535_s14, %s27_s27  }
  0x12   : > { %359 = dma.hbm_to_vmem [thread:$0]  (!%p357_p11), %s132_s22, 16, %s134_s25, [#allocation6]  }
  0x13   : > { %p628_p3 = por %p106_p2, %p34_p13  ;;  %p369_p5 = scmp.lt.s32.totalorder %s539_s15, 2 }
  0x14   : > { %s147_s4 = sand.u32 1, %s535_s14   ;;  %s339_s5 = sshll.u32 %s539_s15, 3 }
  0x15   : > { %p36_p7 = por %p35_p0, %p34_p13  ;;  %s338_s6 = sshll.u32 %s147_s4, 3 }
  0x16   : > { %s155_s9 = scalar_lea.hbm %s710_s0, %s339_s5  ;;  %s151_s11 = scalar_lea.vmem [#allocation2], %s338_s6 }
  0x17   : > { %s157_s10 = sshll.u32 %s155_s9, 4  ;;  %s159_s17 = sshll.u32 %s151_s11, 4  ;;  %s158_s10 = int_to_ptr.hbm [resolvable:$true] %s157_s10  ;;  %s160_s17 = int_to_ptr.vmem [resolvable:$true] %s159_s17 }
  0x18   : > { %p638_p10 = pnand %p369_p5, %p36_p7  ;;  %s148_s21 = scalar_lea.sflag [#allocation3], %s147_s4 }
  0x19   : > { %s439_s22 = sshra.s32 %s158_s10, 4  ;;  %s446_s28 = scalar_lea.hbm %s710_s0, 16  ;;  %s440_s22 = int_to_ptr.hbm [resolvable:$true] %s439_s22 }
  0x1a   : > { %s441_s24 = scalar_lea.hbm %s440_s22, 8  ;;  %p443_p11 = pneg %p638_p10 }
  0x1b   : > { %p442_p2 = scmp.ne.s32.totalorder %s440_s22, %s441_s24  ;;  %p447_p0 = scmp.lt.s32.totalorder %s440_s22, %s710_s0 }
  0x1c   : > { %p448_p5 = scmp.lt.s32.totalorder %s446_s28, %s441_s24 }
  0x1d   : > { %p444_p12 = pnand %p443_p11, %p442_p2 }
  0x1e   : > { %p449_p7 = por %p448_p5, %p447_p0 }
  0x1f   : > { %p445_p13 = pneg %p444_p12 }
  0x21   : > { %p450_p9 = pnand %p449_p7, %p445_p13 }
  0x23   : > { %453 = shalt.err (!%p450_p9)
}
  0x24   : > { %363 = dma.hbm_to_vmem [thread:$0]  (!%p638_p10), %s158_s10, 128, %s160_s17, %s148_s21  }
  0x25   : > { %168 = sbr.rel (%p605_p8) target bundleno = 317 (0x13d), region = 32  ;;  %s655_s4 = sand.u32 (!%p605_p8), 1, %s531_s13  }
  0x26   : > { %s341_s7 = sshll.u32 (!%p605_p8), %s655_s4, 3  ;;  %s171_s8 = scalar_lea.sflag (!%p605_p8), [#allocation3], %s655_s4 }
  0x27   : > { %s174_s9 = scalar_lea.vmem (!%p605_p8), [#allocation2], %s341_s7 }
  0x2a   : > { %514 = dma.done.wait (%p592_p4), %s171_s8, 128  }
  0x2b   : > { %516 = vsyncadd (%p592_p4), %s171_s8, 4294967168 }
  0x2c   : > { %518 = dma.done.wait (%p41_p1), [#allocation6], 16  }
  0x2d   : > { %520 = vsyncadd (%p41_p1), [#allocation6], 4294967280  ;;  %vm204_vm0 = vcmask 261120   ;;  %v203_v0 = vld [vmem:[%s174_s9] sm:$0xff]  ;;  %s345_s18 = sshll.u32 %s583_s16, 3  ;;  %s202_s21 = scalar_lea.vmem [#allocation7], %s341_s7 }
  0x2e   : > { %v205_v1 = vsel %vm204_vm0, %v203_v0, 0.0  ;;  %v405_v16 = vld [vmem:[#allocation5] ss:$0 sm:$0xff]  ;;  %s249_s11 = scalar_lea.hbm %s713_s3, %s345_s18  ;;  %v406_v18 = vld [vmem:[%s712_s2] ss:$0 sm:$0xff]  ;;  %s251_s22 = sshll.u32 %s202_s21, 4  ;;  %s252_s22 = int_to_ptr.vmem [resolvable:$true] %s251_s22 }
  0x2f   : > { %206 = vadd.xlane.f32.xlu0 %v205_v1  ;;  %s253_s16 = sshll.u32 %s249_s11, 4  ;;  %s239_s24 = scalar_lea.sflag [#allocation4], %s655_s4  ;;  %s254_s16 = int_to_ptr.hbm [resolvable:$true] %s253_s16 }
  0x30   : > { %s483_s25 = sshra.s32 %s254_s16, 4  ;;  %s489_s6 = scalar_lea.hbm %s713_s3, 16  ;;  %s484_s25 = int_to_ptr.hbm [resolvable:$true] %s483_s25 }
  0x31   : > { %s485_s27 = scalar_lea.hbm %s484_s25, 8  ;;  %p490_p9 = scmp.lt.s32.totalorder %s484_s25, %s713_s3 }
  0x32   : > { %p486_p1 = scmp.ne.s32.totalorder %s484_s25, %s485_s27  ;;  %p491_p10 = scmp.lt.s32.totalorder %s489_s6, %s485_s27 }
  0x34   : > { %p487_p4 = pnand %p486_p1, %p628_p3  ;;  %p492_p2 = por %p491_p10, %p490_p9 }
  0x36   : > { %p488_p8 = pneg %p487_p4 }
  0x38   : > { %p493_p11 = pnand %p492_p2, %p488_p8 }
  0xa2   : > { %v207_v2 = vpop.xlane.xlu0 %206 }
  0xa3   : > { %v208_v3 = vmul.f32 0.03125, %v207_v2 }
  0xa5   : > { %v209_v4 = vsub.f32 %v203_v0, %v208_v3 }
  0xa7   : > { %v210_v5 = vmul.f32 %v209_v4, %v209_v4 }
  0xa9   : > { %v211_v6 = vsel %vm204_vm0, %v210_v5, 0.0 }
  0xaa   : > { %212 = vadd.xlane.f32.xlu0 %v211_v6 }
 0x11d   : > { %v213_v7 = vpop.xlane.xlu0 %212 }
 0x11e   : > { %v214_v8 = vmul.f32 0.03125, %v213_v7 }
 0x120   : > { %v215_v9 = vadd.f32 1e-05, %v214_v8 }
 0x122   : > { %407 = vrsqrt.f32 %v215_v9  ;;  %vm222_vm2 = vweird.f32 %v215_v9 }
 0x128   : > { %v408_v10 = vpop.eup %407 }
 0x129   : > { %v217_v11 = vmul.f32 %v408_v10, %v215_v9  ;;  %vm223_vm1 = vweird.f32 %v408_v10 }
 0x12a   : > { %vm224_vm3 = vmor %vm222_vm2, %vm223_vm1 }
 0x12b   : > { %v218_v12 = vmul.f32 %v408_v10, %v217_v11 }
 0x12d   : > { %v219_v13 = vmul.f32 0.5, %v218_v12 }
 0x12f   : > { %v220_v14 = vsub.f32 1.5, %v219_v13 }
 0x131   : > { %v221_v15 = vmul.f32 %v408_v10, %v220_v14 }
 0x133   : > { %v225_v17 = vsel %vm224_vm3, %v408_v10, %v221_v15 }
 0x134   : > { %v226_v19 = vmul.f32 %v225_v17, %v209_v4 }
 0x136   : > { %v231_v20 = vmul.f32 %v405_v16, %v226_v19 }
 0x138   : > { %v236_v21 = vadd.f32 %v406_v18, %v231_v20 }
 0x13a   : > { %237 = vst.msk [vmem:[%s202_s21] sm:$0xff] %vm204_vm0, %v236_v21 }
 0x13b   : > { %496 = shalt.err (!%p493_p11)
}
 0x13c   : > { %354 = dma.vmem_to_hbm [thread:$0]  (%p628_p3), %s252_s22, 128, %s254_s16, %s239_s24  }
 0x13d PF: > { %s265_s4 = sand.u32 1, %s527_s12   ;;  %p719_p12 = scmp.ge.s32.totalorder %s539_s15, 2 }
 0x13e   : > { %s266_s9 = scalar_lea.sflag [#allocation4], %s265_s4 }
 0x13f   : > { %p365_p13 = pnand %p719_p12, %p597_p6 }
 0x141   : > { %p366_p0 = pneg %p365_p13 }
 0x143   : > { %522 = dma.done.wait (%p366_p0), %s266_s9, 128  }
 0x144   : > { %524 = vsyncadd (%p366_p0), %s266_s9, 4294967168  ;;  %p17_p5 = scmp.ge.s32.totalorder %s615_s26, 4   ;;  %s720_s12 = smov %s531_s13 }
 0x145   : > { %s721_s13 = smov %s535_s14  ;;  %s722_s14 = smov %s624_s29 }
 0x146   : > { %s723_s15 = smov %s615_s26  ;;  %19 = sbr.rel (!%p17_p5) target bundleno = 6 (0x6), region = 81 }
 0x14b   :  { %272 = vsyncpa [#allocation3], 1 }
 0x14c   :  { %274 = vsyncpa [#allocation3 + $0x1], 1 }
 0x14d   :  { %275 = vsyncpa [#allocation6], 1 }
 0x14e   :  { %276 = vsyncpa [#allocation4], 1 }
 0x14f   :  { %278 = vsyncpa [#allocation4 + $0x1], 1 }

</bundles_post_ra>
